<compile_context>
chip_gen: v7x
topology: tpu7x:2x2x1
jax: 0.10.0
libtpu: 0.0.40
codegen_flags: <defaults>
</compile_context>

<pallas_src>
import functools

import jax
import jax.numpy as jnp
from jax.experimental import pallas as pl
from jax.experimental.pallas import tpu as pltpu


def _round_up(v, m):
    return ((v + m - 1) // m) * m


@functools.lru_cache(maxsize=1)
def _vmem_budget_bytes():
    """~85% of per-core VMEM, capped so Mosaic keeps internal-scratch headroom."""
    cap = 64 << 20  # safe default (v7x per-core VMEM)
    try:
        info = pltpu.get_tpu_info()
        cap = int(getattr(info, "vmem_capacity_bytes", cap) or cap)
    except Exception:
        pass
    return min(int(cap * 0.85), 112 << 20)


def _choose_tiling(M, K, N, in_item, out_item, budget):
    """Pick (TM, TK, TN, Mp, Kp, Np, multi_k) under a per-core VMEM budget."""
    # --- N: single lane-dense block when the double-buffered (K, N) weight
    #     slab is comfortably affordable (the common FiLM case); otherwise
    #     ~512-wide 128-multiple tiles sized by ceil-division to limit waste.
    if 2 * K * N * in_item <= budget // 2:
        TN, Np = N, N
    else:
        n_tiles = pl.cdiv(N, 512)
        TN = _round_up(pl.cdiv(N, n_tiles), 128)
        Np = TN * n_tiles

    # --- K: single block (no accumulator, W fetched once) when the (K, TN)
    #     slab fits; else 128-multiple tiles via ceil-division.
    if 2 * K * TN * in_item <= budget // 2:
        TK, Kp, multi_k = K, K, False
    else:
        tk_cap = max(128, ((budget // 2) // (2 * TN * in_item)) // 128 * 128)
        k_tiles = pl.cdiv(K, tk_cap)
        TK = _round_up(pl.cdiv(K, k_tiles), 128)
        Kp = TK * k_tiles
        multi_k = True

    # --- M: largest tile whose exact double-buffered footprint fits the
    #     budget, then ceil-divided over M to avoid padding waste.
    fixed = 2 * TK * TN * in_item + 2 * 8 * TN * 4
    per_row = 2 * TK * in_item + 2 * TN * out_item + (4 * TN if multi_k else 0)
    tm_cap = max(8, (budget - fixed) // per_row)
    TM = max(8, min(512, tm_cap, _round_up(M, 8)) // 8 * 8)
    m_tiles = pl.cdiv(M, TM)
    if m_tiles == 1:
        TM, Mp = M, M  # full-extent block: no 8-alignment or padding needed
    else:
        TM = _round_up(pl.cdiv(M, m_tiles), 8)
        Mp = TM * m_tiles
    return TM, TK, TN, Mp, Kp, Np, multi_k


def _film_kernel_fused(x_ref, w_ref, gb_ref, o_ref):
    # Single-K-block path: matmul + FiLM epilogue in one shot, no scratch.
    # x_ref: (TM, K); w_ref: (K, TN); gb_ref: (8, TN) [row0=gamma, row1=fused beta]
    y = jnp.dot(x_ref[...], w_ref[...], preferred_element_type=jnp.float32)
    o_ref[...] = (gb_ref[0:1, :] * y + gb_ref[1:2, :]).astype(o_ref.dtype)


def _film_kernel_ktiled(x_ref, w_ref, gb_ref, o_ref, acc_ref):
    # Fallback for very large K: f32 accumulator, init/finalize on the K axis.
    k = pl.program_id(2)

    @pl.when(k == 0)
    def _():
        acc_ref[...] = jnp.zeros_like(acc_ref)

    acc_ref[...] += jnp.dot(x_ref[...], w_ref[...],
                            preferred_element_type=jnp.float32)

    @pl.when(k == pl.num_programs(2) - 1)
    def _():
        o_ref[...] = (gb_ref[0:1, :] * acc_ref[...]
                      + gb_ref[1:2, :]).astype(o_ref.dtype)


@functools.partial(jax.jit, static_argnames=("compute_dtype", "out_dtype"))
def film_forward(x, w_lin, b_lin, gamma, beta,
                 compute_dtype=jnp.bfloat16, out_dtype=None):
    """x: (B, S, K); w_lin: (K, N); b_lin/gamma/beta: (N,). Returns (B, S, N).

    compute_dtype: MXU input dtype for x and W (default bf16; accumulation and
    the FiLM epilogue stay f32).  out_dtype: output dtype (default x.dtype).
    """
    B, S, K = x.shape
    N = w_lin.shape[1]
    M = B * S

    cdtype = jnp.dtype(compute_dtype) if compute_dtype is not None else jnp.dtype(x.dtype)
    odtype = jnp.dtype(out_dtype) if out_dtype is not None else jnp.dtype(x.dtype)
    in_item, out_item = cdtype.itemsize, odtype.itemsize

    budget = _vmem_budget_bytes()
    TM, TK, TN, Mp, Kp, Np, multi_k = _choose_tiling(
        M, K, N, in_item, out_item, budget)
    m_tiles, n_tiles, k_tiles = Mp // TM, Np // TN, Kp // TK

    # ---- operands: pad only when the padded extent differs, then cast ----
    x2 = x.reshape(M, K)
    if (Mp, Kp) != (M, K):
        x2 = jnp.pad(x2, ((0, Mp - M), (0, Kp - K)))
    xp = x2.astype(cdtype)

    w2 = w_lin if (Kp, Np) == (K, N) else jnp.pad(w_lin, ((0, Kp - K), (0, Np - N)))
    wp = w2.astype(cdtype)

    # gamma / fused-beta slab (row 0 = gamma, row 1 = gamma*b + beta), f32.
    gamma_f = gamma.astype(jnp.float32)
    beta_fused = gamma_f * b_lin.astype(jnp.float32) + beta.astype(jnp.float32)
    gb = jnp.zeros((8, Np), jnp.float32)
    gb = gb.at[0, :N].set(gamma_f).at[1, :N].set(beta_fused)

    # ---- exact VMEM footprint (double-buffered tiles + optional f32 acc) ----
    vmem_bytes = (2 * TM * TK * in_item + 2 * TK * TN * in_item
                  + 2 * 8 * TN * 4 + 2 * TM * TN * out_item
                  + (TM * TN * 4 if multi_k else 0))
    vmem_limit = int(min(max(vmem_bytes + (4 << 20), 16 << 20), budget))

    # W is fetched from HBM once iff it is a single block; otherwise it
    # re-streams once per M tile (M is the outermost grid axis).  x re-streams
    # once per N tile.
    w_passes = 1 if (n_tiles == 1 and k_tiles == 1) else m_tiles
    cost = pl.CostEstimate(
        flops=2 * Mp * Kp * Np,
        transcendentals=0,
        bytes_accessed=(Mp * Kp * in_item * n_tiles
                        + Kp * Np * in_item * w_passes
                        + 8 * Np * 4 + Mp * Np * out_item),
    )

    if multi_k:
        # TODO(synk): consider pipeline_mode=pl.Buffered(3) on the W spec here
        # when the VMEM budget allows (hides the W re-fetch behind MXU work).
        grid = (m_tiles, n_tiles, k_tiles)
        in_specs = [
            pl.BlockSpec((TM, TK), lambda i, j, k: (i, k)),
            pl.BlockSpec((TK, TN), lambda i, j, k: (k, j)),
            pl.BlockSpec((8, TN), lambda i, j, k: (0, j)),
        ]
        out_specs = pl.BlockSpec((TM, TN), lambda i, j, k: (i, j))
        scratch = [pltpu.VMEM((TM, TN), jnp.float32)]
        kernel = _film_kernel_ktiled
        dims = ("parallel", "parallel", "arbitrary")
    else:
        grid = (m_tiles, n_tiles)
        in_specs = [
            pl.BlockSpec((TM, TK), lambda i, j: (i, 0)),
            pl.BlockSpec((TK, TN), lambda i, j: (0, j)),
            pl.BlockSpec((8, TN), lambda i, j: (0, j)),
        ]
        out_specs = pl.BlockSpec((TM, TN), lambda i, j: (i, j))
        scratch = []
        kernel = _film_kernel_fused
        # Both axes parallel: v7x megacore still has work when m_tiles == 1.
        dims = ("parallel", "parallel")

    out = pl.pallas_call(
        kernel,
        out_shape=jax.ShapeDtypeStruct((Mp, Np), odtype),
        grid_spec=pltpu.PrefetchScalarGridSpec(
            num_scalar_prefetch=0,
            grid=grid,
            in_specs=in_specs,
            out_specs=out_specs,
            scratch_shapes=scratch,
        ),
        compiler_params=pltpu.CompilerParams(
            dimension_semantics=dims,
            vmem_limit_bytes=vmem_limit,
        ),
        cost_estimate=cost,
    )(xp, wp, gb)

    if (Mp, Np) != (M, N):
        out = out[:M, :N]
    return out.reshape(B, S, N)


def hyper_film(params, layer_idx):
    """Tiny hypernetwork: layer embedding -> MLP(hyper_hidden) -> (gamma, beta)."""
    emb = params["layer_emb"][layer_idx]                     # (hyper_hidden,)
    h = jnp.tanh(emb @ params["w1"] + params["b1"])          # (hyper_hidden,)
    gb = h @ params["w2"] + params["b2"]                     # (2 * out_features,)
    out_features = gb.shape[0] // 2
    return gb[:out_features], gb[out_features:]


def init_params(key, in_features, out_features, hyper_hidden, num_layers):
    ks = jax.random.split(key, 7)
    scale_lin = 1.0 / jnp.sqrt(in_features)
    scale_h1 = 1.0 / jnp.sqrt(hyper_hidden)
    return {
        # nn.Linear(in_features, out_features, bias) — stored pre-transposed (K, N)
        "w_lin": jax.random.uniform(ks[0], (in_features, out_features),
                                    jnp.float32, -scale_lin, scale_lin),
        "b_lin": jax.random.uniform(ks[1], (out_features,),
                                    jnp.float32, -scale_lin, scale_lin),
        # hypernetwork
        "layer_emb": jax.random.normal(ks[2], (num_layers, hyper_hidden),
                                       jnp.float32) * 0.1,
        "w1": jax.random.uniform(ks[3], (hyper_hidden, hyper_hidden),
                                 jnp.float32, -scale_h1, scale_h1),
        "b1": jnp.zeros((hyper_hidden,), jnp.float32),
        "w2": jax.random.uniform(ks[4], (hyper_hidden, 2 * out_features),
                                 jnp.float32, -scale_h1, scale_h1),
        # bias init so gamma starts near 1, beta near 0
        "b2": jnp.concatenate([jnp.ones((out_features,), jnp.float32),
                               jnp.zeros((out_features,), jnp.float32)]),
    }


def reference_forward(params, x, layer_idx):
    """Pure-JAX reference matching FiLM.forward."""
    y = jnp.einsum("bsk,kn->bsn", x, params["w_lin"]) + params["b_lin"]
    gamma, beta = hyper_film(params, layer_idx)
    return gamma * y + beta


if __name__ == "__main__":
    B, S = 2, 8
    in_features, out_features = 32, 64
    hyper_hidden = 16
    num_layers = 4
    layer_idx = 1

    key = jax.random.PRNGKey(0)
    kp, kx = jax.random.split(key)
    params = init_params(kp, in_features, out_features, hyper_hidden, num_layers)
    x = jax.random.normal(kx, (B, S, in_features), jnp.float32)

    gamma, beta = hyper_film(params, layer_idx)
    ref = reference_forward(params, x, layer_idx)

    # f32 MXU path: tight-tolerance check against the f32 reference.
    out_f32 = film_forward(x, params["w_lin"], params["b_lin"], gamma, beta,
                           compute_dtype=jnp.float32)
    out_f32 = jax.block_until_ready(out_f32)
    assert out_f32.shape == (B, S, out_features)
    assert jnp.allclose(out_f32, ref, atol=1e-5, rtol=1e-5)

    # Default bf16-MXU path (f32 accumulation / epilogue): relaxed tolerance.
    out_bf16 = film_forward(x, params["w_lin"], params["b_lin"], gamma, beta)
    out_bf16 = jax.block_until_ready(out_bf16)
    assert out_bf16.shape == (B, S, out_features)
    assert jnp.allclose(out_bf16, ref, atol=5e-2, rtol=5e-2)

    print("KERNEL_OK")
</pallas_src>

<mosaic_0001>
module attributes {stable_mosaic.version = 11 : i64} {
  func.func @_film_kernel_fused(%arg0: i32, %arg1: i32, %arg2: memref<16x32xf32, #tpu.memory_space<vmem>>, %arg3: memref<32x64xf32, #tpu.memory_space<vmem>>, %arg4: memref<8x64xf32, #tpu.memory_space<vmem>>, %arg5: memref<16x64xf32, #tpu.memory_space<vmem>>) attributes {dimension_semantics = [#tpu.dimension_semantics<parallel>, #tpu.dimension_semantics<parallel>], iteration_bounds = array<i64: 1, 1>, scalar_prefetch = 0 : i64, scratch_operands = 0 : i64, tpu.core_type = #tpu.core_type<tc>, window_params = [{transform_indices = @transform_0, window_bounds = array<i64: 16, 32>}, {transform_indices = @transform_1, window_bounds = array<i64: 32, 64>}, {transform_indices = @transform_2, window_bounds = array<i64: 8, 64>}, {transform_indices = @transform_3, window_bounds = array<i64: 16, 64>}]} {
    %c0 = arith.constant 0 : index
    %c0_0 = arith.constant 0 : index
    %0 = vector.load %arg2[%c0, %c0_0] : memref<16x32xf32, #tpu.memory_space<vmem>>, vector<16x32xf32>
    %c0_1 = arith.constant 0 : index
    %c0_2 = arith.constant 0 : index
    %1 = vector.load %arg3[%c0_1, %c0_2] : memref<32x64xf32, #tpu.memory_space<vmem>>, vector<32x64xf32>
    %cst = arith.constant dense<0.000000e+00> : vector<16x64xf32>
    %2 = tpu.matmul %0, %1, %cst {dimension_numbers = #tpu.dot_dimension_numbers<[1], [0], [0], [1], [0, 0, 1, 1], [], []>} : vector<16x32xf32>, vector<32x64xf32>, vector<16x64xf32> -> vector<16x64xf32>
    %c0_3 = arith.constant 0 : index
    %c0_4 = arith.constant 0 : index
    %3 = vector.load %arg4[%c0_3, %c0_4] : memref<8x64xf32, #tpu.memory_space<vmem>>, vector<1x64xf32>
    %4 = vector.broadcast %3 : vector<1x64xf32> to vector<16x64xf32>
    %5 = arith.mulf %4, %2 : vector<16x64xf32>
    %c1 = arith.constant 1 : index
    %c0_5 = arith.constant 0 : index
    %6 = vector.load %arg4[%c1, %c0_5] : memref<8x64xf32, #tpu.memory_space<vmem>>, vector<1x64xf32>
    %7 = vector.broadcast %6 : vector<1x64xf32> to vector<16x64xf32>
    %8 = arith.addf %5, %7 : vector<16x64xf32>
    %c0_6 = arith.constant 0 : index
    %c0_7 = arith.constant 0 : index
    %9 = vector.load %arg5[%c0_6, %c0_7] : memref<16x64xf32, #tpu.memory_space<vmem>>, vector<16x64xf32>
    tpu.vector_store %arg5[%c0_6, %c0_7], %8 {strides = array<i32>} : memref<16x64xf32, #tpu.memory_space<vmem>>, vector<16x64xf32>,
    return
  }
  func.func @transform_0(%arg0: i32, %arg1: i32) -> (i32, i32) {
    %c0_i32 = arith.constant 0 : i32
    %c0_i32_0 = arith.constant 0 : i32
    return %arg0, %c0_i32 : i32, i32
  }
  func.func @transform_1(%arg0: i32, %arg1: i32) -> (i32, i32) {
    %c0_i32 = arith.constant 0 : i32
    %c0_i32_0 = arith.constant 0 : i32
    return %c0_i32, %arg1 : i32, i32
  }
  func.func @transform_2(%arg0: i32, %arg1: i32) -> (i32, i32) {
    %c0_i32 = arith.constant 0 : i32
    %c0_i32_0 = arith.constant 0 : i32
    return %c0_i32, %arg1 : i32, i32
  }
  func.func @transform_3(%arg0: i32, %arg1: i32) -> (i32, i32) {
    %c0_i32 = arith.constant 0 : i32
    return %arg0, %arg1 : i32, i32
  }
}

</mosaic_0001>

<bundles_post_ra>
// kernel: film_forward.1
= control target key start
LH: loop header
LB: loop body
LE: loop exit
PB: predicated region body
PF: predicated region fallthrough
CT: control target
= control target key end

     0   :  { %8 = vsyncpa [#allocation3], 0  ;;  %s298_s0 = inlined_call_operand.vmem [shape: f32[16,32], index: 0, kind: input, shape index: {}]   ;;  %s299_s1 = inlined_call_operand.hbm [shape: f32[32,64], index: 1, kind: input, shape index: {}]   ;;  %s300_s2 = inlined_call_operand.vmem [shape: f32[8,64], index: 2, kind: input, shape index: {}]   ;;  %s301_s3 = inlined_call_operand.hbm [shape: f32[16,64], index: 3, kind: output, shape index: {}]  }
   0x1   :  { %9 = vsyncpa [#allocation4], 0  ;;  %s232_s12 = smov [#allocation2]   ;;  %s184_s16 = scalar_lea.hbm %s299_s1, 512 }
   0x2   :  { %s17_s13 = sshll.u32 %s232_s12, 4  ;;  %p185_p0 = scmp.ne.s32.totalorder %s299_s1, %s184_s16  ;;  %s18_s13 = int_to_ptr.vmem [resolvable:$true] %s17_s13 }
   0x3   :  { %p188_p1 = scmp.lt.u32.totalorder %s184_s16, %s299_s1 }
   0x5   :  { %p190_p2 = pnand %p188_p1, %p185_p0 }
   0x7   :  { %193 = shalt.err (!%p190_p2)
}
   0x8   :  { %s194_s21 = scalar_lea.vmem %s18_s13, 512  ;;  %p199_p4 = scmp.lt.s32.totalorder %s18_s13, %s18_s13 }
   0x9   :  { %p195_p3 = scmp.ne.s32.totalorder %s18_s13, %s194_s21  ;;  %p200_p5 = scmp.lt.s32.totalorder %s194_s21, %s194_s21 }
   0xb   :  { %p201_p6 = por %p200_p5, %p199_p4 }
   0xd   :  { %p202_p7 = pnand %p201_p6, %p195_p3 }
   0xf   :  { %205 = shalt.err (!%p202_p7)
}
  0x10   :  { %s233_s22 = smov 128   ;;  %s234_s23 = smov 8  }
  0x11   :  { %23 = dma.hbm_to_vmem [thread:$0]  %s299_s1, 512, %s18_s13, [#allocation3], %s233_s22, %s233_s22, %s234_s23  }
  0x12   :  { %228 = dma.done.wait [#allocation3], 512  }
  0x13   :  { %229 = vsyncadd [#allocation3], 4294966784  ;;  %vm35_vm0 = vcmask 261120   ;;  %v31_v0 = vld [vmem:[#allocation2] sm:$0xff]  ;;  %v32_v1 = vld [vmem:[#allocation2 + $0x8] sm:$0xff]  ;;  %s235_s6 = smov [#allocation5]  }
  0x14   :  { %v33_v2 = vld [vmem:[#allocation2 + $0x10] sm:$0xff]  ;;  %v172_v3 = vpack.c.bf16 %v32_v1, %v31_v0  ;;  %v34_v4 = vld [vmem:[#allocation2 + $0x18] sm:$0xff]  ;;  %v29_v5 = vld [vmem:[%s298_s0] sm:$0xff]  ;;  %s139_s7 = sshll.u32 %s235_s6, 4  ;;  %vm131_vm1 = vcmask 523264   ;;  %s140_s7 = int_to_ptr.vmem [resolvable:$true] %s139_s7 }
  0x15   :  { %v176_v6 = vpack.c.bf16 %v34_v4, %v33_v2  ;;  %169 = vmatprep.mubr.msk.f32.mxu0 %vm35_vm0, %v29_v5  ;;  %v30_v7 = vld [vmem:[%s298_s0 + $0x8] sm:$0xff]  ;;  %v153_v8 = vld [vmem:[%s300_s2] ss:$0 sm:$0xff]  ;;  %v154_v10 = vld [vmem:[%s300_s2 + $0x1] ss:$0 sm:$0xff]  ;;  %s206_s0 = scalar_lea.vmem %s140_s7, 256  ;;  %p211_p9 = scmp.lt.s32.totalorder %s140_s7, %s140_s7 }
  0x16   :  { %173 = vmatprep.subr.bf16.mxu0 %v172_v3  ;;  %p207_p8 = scmp.ne.s32.totalorder %s140_s7, %s206_s0  ;;  %p212_p10 = scmp.lt.s32.totalorder %s206_s0, %s206_s0 }
  0x17   :  { %175 = vmatpush3.bf16.msra.mxu0 %v172_v3 }
  0x18   :  { %177 = vmatprep.subr.bf16.mxu0 %v176_v6  ;;  %p213_p11 = por %p212_p10, %p211_p9 }
  0x1a   :  { %p214_p12 = pnand %p213_p11, %p207_p8 }
  0x1b   :  { %179 = vmatpush3.bf16.msra.mxu0 %v176_v6 }
  0x1e   :  { %170 = vmatmul.mubr.msk.f32.vlgmr.msra.gmra.mrb[0].mxu0 %vm35_vm0, %v30_v7 }
  0xf1   :  { %v171_v9 = vpop.f32.mrb[0].mxu0 }
  0xf2   :  { %v123_v11 = vmul.f32 %v171_v9, %v153_v8  ;;  %v108_v12 = vpop.f32.mrb[1].mxu0 }
  0xf3   :  { %v122_v13 = vmul.f32 %v153_v8, %v108_v12 }
  0xf4   :  { %v130_v14 = vadd.f32 %v154_v10, %v123_v11 }
  0xf5   :  { %v129_v15 = vadd.f32 %v154_v10, %v122_v13 }
  0xf6   :  { %133 = vst.msk [vmem:[#allocation5 + $0x8] sm:$0xff] %vm131_vm1, %v130_v14 }
  0xf7   :  { %132 = vst.msk [vmem:[#allocation5] sm:$0xff] %vm131_vm1, %v129_v15 }
  0xf8   :  { %217 = shalt.err (!%p214_p12)
}
  0xf9   :  { %s218_s9 = scalar_lea.hbm %s301_s3, 256 }
  0xfa   :  { %p219_p13 = scmp.ne.s32.totalorder %s301_s3, %s218_s9  ;;  %p222_p0 = scmp.lt.u32.totalorder %s218_s9, %s301_s3 }
  0xfc   :  { %p224_p1 = pnand %p222_p0, %p219_p13 }
  0xfe   :  { %227 = shalt.err (!%p224_p1)
}
  0xff   :  { %145 = dma.vmem_to_hbm [thread:$0]  %s140_s7, 256, %s301_s3, [#allocation4], %s233_s22, %s233_s22, %s234_s23  }
 0x100   :  { %230 = dma.done.wait [#allocation4], 256  }
 0x101   :  { %231 = vsyncadd [#allocation4], 4294967040 }
 0x102   :  { %149 = vsyncpa [#allocation3], 1 }
 0x103   :  { %150 = vsyncpa [#allocation4], 1 }

</bundles_post_ra>
